<compile_context>
chip_gen: v7x
topology: tpu7x:2x2x1
jax: 0.10.0
libtpu: 0.0.40
codegen_flags: <defaults>
</compile_context>

<pallas_src>
import functools

import jax
import jax.numpy as jnp
from jax.experimental import pallas as pl
from jax.experimental.pallas import tpu as pltpu

_EPS = 1e-8
_BIG = 1e30  # finite sentinel for padded rows/columns (avoids inf-inf hazards)


def _round_up(x: int, m: int) -> int:
    return (x + m - 1) // m * m


def _ahd_kernel(x_ref, y_ref, rowsum_out, colmin_out, rowsum_acc, colmin_acc, *,
                n_valid, tn, inner_steps):
    c = pl.program_id(0)   # "parallel" split of the N range (both TCs on v7x)
    i = pl.program_id(1)   # "arbitrary" axis carrying the accumulators

    @pl.when(i == 0)
    def _init():
        rowsum_acc[...] = jnp.zeros_like(rowsum_acc)
        colmin_acc[...] = jnp.full(colmin_acc.shape, _BIG, colmin_acc.dtype)

    # One MXU contraction emits the squared distances directly:
    #   d2 = x_aug @ y_aug = ||x'||^2 + ||y||^2 - 2 x'.y   (+ pad biases)
    d2 = jax.lax.dot_general(x_ref[...], y_ref[...],
                             (((1,), (0,)), ((), ())),
                             preferred_element_type=jnp.float32)   # (TN, M_pad)

    # ---- term_1: padded columns carry +BIG so they never win the row min ----
    row_min_sq = jnp.min(d2, axis=1, keepdims=True)                # (TN, 1)
    row_min = jnp.sqrt(jnp.maximum(row_min_sq, 0.0))               # rank-1 clamp
    row_start = (c * inner_steps + i) * tn
    row_ids = jax.lax.broadcasted_iota(jnp.int32, (tn, 1), 0) + row_start
    row_min = jnp.where(row_ids < n_valid, row_min, 0.0)           # rank-1 mask
    rowsum_acc[...] += jnp.sum(row_min, axis=0, keepdims=True)     # (1, 1)

    # ---- term_2: running column minima of squared distances ----------------
    # Padded rows carry +BIG so they never win. Fold TN -> 8 sublanes with
    # elementwise mins only; the 8 -> 1 min + sqrt happen outside the kernel.
    d2_8 = jnp.min(d2.reshape(tn // 8, 8, d2.shape[1]), axis=0)    # (8, M_pad)
    colmin_acc[...] = jnp.minimum(colmin_acc[...], d2_8)

    @pl.when(i == inner_steps - 1)
    def _finalize():
        rowsum_out[...] = rowsum_acc[...].reshape(rowsum_out.shape)
        colmin_out[...] = colmin_acc[...].reshape(colmin_out.shape)


def averaged_hausdorff_loss(set1, set2, directed: bool = False):
    assert set1.ndim == 2, f"got {set1.ndim}"
    assert set2.ndim == 2, f"got {set2.ndim}"
    assert set1.shape[1] == set2.shape[1], (
        "The points in both sets must have the same number of dimensions, "
        f"got {set1.shape[1]} and {set2.shape[1]}.")

    n, d = set1.shape
    m, _ = set2.shape
    f32 = jnp.float32

    split = 2                      # leading "parallel" axis: both TCs on v7x
    m_pad = _round_up(m, 128)      # lane-dense M

    # (TN, M_pad) f32 tile cap — conservative so ~2-3 live full-tile temps plus
    # resident y_aug and the (8, M_pad) scratch fit even v5e's scoped default;
    # vmem_limit_bytes below makes the budget explicit on every generation.
    max_tile_bytes = 2 * 1024 * 1024
    tn_cap = max(8, (max_tile_bytes // (m_pad * 4)) // 8 * 8)
    n_per_core = -(-n // split)
    tn = max(8, min(1024, _round_up(max(n_per_core, 1), 8), tn_cap))
    n_pad = _round_up(max(n, 1), split * tn)
    inner_steps = n_pad // (split * tn)

    # ---- augmented operands, built ONCE in XLA (O((N+M)D)) -------------------
    # Fold the reference cdist's per-coordinate epsilon into set1:
    # (x - y + eps)^2 == ((x + eps) - y)^2.
    x = jnp.pad(set1.astype(f32) + _EPS, ((0, n_pad - n), (0, 0)))   # (n_pad, d)
    row_valid = jnp.arange(n_pad) < n
    x_norm = (jnp.sum(x * x, axis=1, keepdims=True)
              + jnp.where(row_valid, 0.0, _BIG)[:, None])            # row-pad bias
    x_aug = jnp.concatenate(
        [-2.0 * x, x_norm, jnp.ones((n_pad, 1), f32)], axis=1)       # (n_pad, d+2)

    y = jnp.pad(set2.astype(f32), ((0, m_pad - m), (0, 0)))          # (m_pad, d)
    col_valid = jnp.arange(m_pad) < m
    y_norm = jnp.sum(y * y, axis=1) + jnp.where(col_valid, 0.0, _BIG)  # col-pad bias
    y_aug = jnp.concatenate(
        [y.T, jnp.ones((1, m_pad), f32), y_norm[None, :]], axis=0)   # (d+2, m_pad)

    kernel = functools.partial(
        _ahd_kernel, n_valid=n, tn=tn, inner_steps=inner_steps)

    rowsum_parts, colmin_parts = pl.pallas_call(
        kernel,
        out_shape=(
            jax.ShapeDtypeStruct((split, 1, 1), f32),       # per-core row-min sums
            jax.ShapeDtypeStruct((split, 8, m_pad), f32),   # per-core col-min (sq)
        ),
        grid_spec=pltpu.PrefetchScalarGridSpec(
            num_scalar_prefetch=0,
            grid=(split, inner_steps),
            in_specs=[
                pl.BlockSpec((tn, d + 2), lambda c, i: (c * inner_steps + i, 0)),
                pl.BlockSpec((d + 2, m_pad), lambda c, i: (0, 0)),   # resident set2
            ],
            out_specs=[
                pl.BlockSpec((1, 1, 1), lambda c, i: (c, 0, 0)),
                pl.BlockSpec((1, 8, m_pad), lambda c, i: (c, 0, 0)),
            ],
            scratch_shapes=[
                pltpu.VMEM((1, 1), f32),       # running sum of row-min distances
                pltpu.VMEM((8, m_pad), f32),   # running column min (squared)
            ],
        ),
        compiler_params=pltpu.CompilerParams(
            dimension_semantics=("parallel", "arbitrary"),
            vmem_limit_bytes=32 * 1024 * 1024),
        cost_estimate=pl.CostEstimate(
            flops=2 * n_pad * m_pad * (d + 2) + 4 * n_pad * m_pad,
            transcendentals=n_pad,
            bytes_accessed=(n_pad * (d + 2) + (d + 2) * m_pad
                            + split * (1 + 8 * m_pad)) * 4),
    )(x_aug, y_aug)

    term_1 = jnp.sum(rowsum_parts) / n
    if directed:
        return term_1

    colmin = jnp.min(colmin_parts, axis=(0, 1))            # (m_pad,)
    col_d = jnp.sqrt(jnp.maximum(colmin, 0.0))
    col_d = jnp.where(col_valid, col_d, 0.0)
    term_2 = jnp.sum(col_d) / m
    return term_1 + term_2


def _reference(set1, set2, directed=False):
    # Pure-JAX reference mirroring the PyTorch module exactly.
    diff = set1[:, None, :] - set2[None, :, :] + _EPS
    dist = jnp.sqrt(jnp.sum(diff ** 2, axis=-1))
    term_1 = jnp.mean(jnp.min(dist, axis=1))
    term_2 = jnp.mean(jnp.min(dist, axis=0))
    return term_1 if directed else term_1 + term_2


if __name__ == "__main__":
    key = jax.random.PRNGKey(0)
    k1, k2, k3, k4 = jax.random.split(key, 4)

    # Case 1: small unordered point sets (N=64, M=32, D=8), both variants.
    set1 = jax.random.normal(k1, (64, 8), dtype=jnp.float32)
    set2 = jax.random.normal(k2, (32, 8), dtype=jnp.float32) * 2.0 + 0.5

    out = jax.block_until_ready(averaged_hausdorff_loss(set1, set2, directed=False))
    ref = _reference(set1, set2, directed=False)
    assert jnp.allclose(out, ref, rtol=1e-4, atol=1e-4), (out, ref)

    out_d = jax.block_until_ready(averaged_hausdorff_loss(set1, set2, directed=True))
    ref_d = _reference(set1, set2, directed=True)
    assert jnp.allclose(out_d, ref_d, rtol=1e-4, atol=1e-4), (out_d, ref_d)

    # Case 2: ragged sizes exercising row/column padding (N=100, M=50, D=3).
    set1b = jax.random.normal(k3, (100, 3), dtype=jnp.float32) * 1.5
    set2b = jax.random.normal(k4, (50, 3), dtype=jnp.float32) - 0.25
    out_b = jax.block_until_ready(averaged_hausdorff_loss(set1b, set2b, directed=False))
    ref_b = _reference(set1b, set2b, directed=False)
    assert jnp.allclose(out_b, ref_b, rtol=1e-4, atol=1e-4), (out_b, ref_b)

    print("KERNEL_OK")
</pallas_src>

<mosaic_0001>
module attributes {stable_mosaic.version = 11 : i64} {
  func.func @_ahd_kernel(%arg0: i32, %arg1: i32, %arg2: memref<32x10xf32, #tpu.memory_space<vmem>>, %arg3: memref<10x128xf32, #tpu.memory_space<vmem>>, %arg4: memref<1x1x1xf32, #tpu.memory_space<vmem>>, %arg5: memref<1x8x128xf32, #tpu.memory_space<vmem>>, %arg6: memref<1x1xf32, #tpu.memory_space<vmem>>, %arg7: memref<8x128xf32, #tpu.memory_space<vmem>>) attributes {dimension_semantics = [#tpu.dimension_semantics<parallel>, #tpu.dimension_semantics<arbitrary>], iteration_bounds = array<i64: 2, 1>, scalar_prefetch = 0 : i64, scratch_operands = 2 : i64, tpu.core_type = #tpu.core_type<tc>, window_params = [{transform_indices = @transform_0, window_bounds = array<i64: 32, 10>}, {pipeline_mode = #tpu.pipeline_mode<synchronous>, transform_indices = @transform_1, window_bounds = array<i64: 10, 128>}, {transform_indices = @transform_2, window_bounds = array<i64: 1, 1, 1>}, {transform_indices = @transform_3, window_bounds = array<i64: 1, 8, 128>}]} {
    %c0_i32 = arith.constant 0 : i32
    %0 = arith.cmpi eq, %arg1, %c0_i32 : i32
    %1 = arith.extui %0 : i1 to i32
    %c0_i32_0 = arith.constant 0 : i32
    %2 = arith.cmpi ne, %1, %c0_i32_0 : i32
    scf.if %2 {
      %cst_19 = arith.constant 0.000000e+00 : f32
      %34 = vector.broadcast %cst_19 : f32 to vector<1x1xf32>
      %c0_20 = arith.constant 0 : index
      %c0_21 = arith.constant 0 : index
      %35 = vector.load %arg6[%c0_20, %c0_21] : memref<1x1xf32, #tpu.memory_space<vmem>>, vector<1x1xf32>
      tpu.vector_store %arg6[%c0_20, %c0_21], %34 {strides = array<i32>} : memref<1x1xf32, #tpu.memory_space<vmem>>, vector<1x1xf32>,
      %cst_22 = arith.constant 1.000000e+30 : f32
      %36 = vector.broadcast %cst_22 : f32 to vector<8x128xf32>
      %c0_23 = arith.constant 0 : index
      %c0_24 = arith.constant 0 : index
      %37 = vector.load %arg7[%c0_23, %c0_24] : memref<8x128xf32, #tpu.memory_space<vmem>>, vector<8x128xf32>
      tpu.vector_store %arg7[%c0_23, %c0_24], %36 {strides = array<i32>} : memref<8x128xf32, #tpu.memory_space<vmem>>, vector<8x128xf32>,
    } else {
    }
    %c0 = arith.constant 0 : index
    %c0_1 = arith.constant 0 : index
    %3 = vector.load %arg2[%c0, %c0_1] : memref<32x10xf32, #tpu.memory_space<vmem>>, vector<32x10xf32>
    %c0_2 = arith.constant 0 : index
    %c0_3 = arith.constant 0 : index
    %4 = vector.load %arg3[%c0_2, %c0_3] : memref<10x128xf32, #tpu.memory_space<vmem>>, vector<10x128xf32>
    %cst = arith.constant dense<0.000000e+00> : vector<32x128xf32>
    %5 = tpu.matmul %3, %4, %cst {dimension_numbers = #tpu.dot_dimension_numbers<[1], [0], [0], [1], [0, 0, 1, 1], [], []>} : vector<32x10xf32>, vector<10x128xf32>, vector<32x128xf32> -> vector<32x128xf32>
    %cst_4 = arith.constant dense<0x7F800000> : vector<32xf32>
    %6 = vector.multi_reduction <minimumf>, %5, %cst_4 [1] : vector<32x128xf32> to vector<32xf32>
    %7 = vector.shape_cast %6 : vector<32xf32> to vector<32x1xf32>
    %cst_5 = arith.constant 0.000000e+00 : f32
    %8 = vector.broadcast %cst_5 : f32 to vector<32x1xf32>
    %9 = arith.maximumf %7, %8 : vector<32x1xf32>
    %10 = math.sqrt %9 : vector<32x1xf32>
    %c1_i32 = arith.constant 1 : i32
    %11 = arith.muli %arg0, %c1_i32 : i32
    %12 = arith.addi %11, %arg1 : i32
    %c32_i32 = arith.constant 32 : i32
    %13 = arith.muli %12, %c32_i32 : i32
    %14 = tpu.iota {dimensions = array<i32: 0>} : vector<32x1xi32>
    %15 = vector.broadcast %13 : i32 to vector<32x1xi32>
    %16 = arith.addi %14, %15 : vector<32x1xi32>
    %c64_i32 = arith.constant 64 : i32
    %17 = vector.broadcast %c64_i32 : i32 to vector<32x1xi32>
    %18 = arith.cmpi slt, %16, %17 : vector<32x1xi32>
    %cst_6 = arith.constant 0.000000e+00 : f32
    %19 = vector.broadcast %cst_6 : f32 to vector<32x1xf32>
    %20 = arith.select %18, %10, %19 : vector<32x1xi1>, vector<32x1xf32>
    %c0_7 = arith.constant 0 : index
    %c0_8 = arith.constant 0 : index
    %21 = vector.load %arg6[%c0_7, %c0_8] : memref<1x1xf32, #tpu.memory_space<vmem>>, vector<1x1xf32>
    %cst_9 = arith.constant dense<0.000000e+00> : vector<1xf32>
    %22 = vector.multi_reduction <add>, %20, %cst_9 [0] : vector<32x1xf32> to vector<1xf32>
    %23 = vector.shape_cast %22 : vector<1xf32> to vector<1x1xf32>
    %24 = arith.addf %21, %23 : vector<1x1xf32>
    %c0_10 = arith.constant 0 : index
    %c0_11 = arith.constant 0 : index
    %25 = vector.load %arg6[%c0_10, %c0_11] : memref<1x1xf32, #tpu.memory_space<vmem>>, vector<1x1xf32>
    tpu.vector_store %arg6[%c0_10, %c0_11], %24 {strides = array<i32>} : memref<1x1xf32, #tpu.memory_space<vmem>>, vector<1x1xf32>,
    %26 = vector.shape_cast %5 : vector<32x128xf32> to vector<4x8x128xf32>
    %cst_12 = arith.constant dense<0x7F800000> : vector<8x128xf32>
    %27 = vector.multi_reduction <minimumf>, %26, %cst_12 [0] : vector<4x8x128xf32> to vector<8x128xf32>
    %c0_13 = arith.constant 0 : index
    %c0_14 = arith.constant 0 : index
    %28 = vector.load %arg7[%c0_13, %c0_14] : memref<8x128xf32, #tpu.memory_space<vmem>>, vector<8x128xf32>
    %29 = arith.minimumf %28, %27 : vector<8x128xf32>
    %c0_15 = arith.constant 0 : index
    %c0_16 = arith.constant 0 : index
    %30 = vector.load %arg7[%c0_15, %c0_16] : memref<8x128xf32, #tpu.memory_space<vmem>>, vector<8x128xf32>
    tpu.vector_store %arg7[%c0_15, %c0_16], %29 {strides = array<i32>} : memref<8x128xf32, #tpu.memory_space<vmem>>, vector<8x128xf32>,
    %c0_i32_17 = arith.constant 0 : i32
    %31 = arith.cmpi eq, %arg1, %c0_i32_17 : i32
    %32 = arith.extui %31 : i1 to i32
    %c0_i32_18 = arith.constant 0 : i32
    %33 = arith.cmpi ne, %32, %c0_i32_18 : i32
    scf.if %33 {
      %c0_19 = arith.constant 0 : index
      %c0_20 = arith.constant 0 : index
      %34 = vector.load %arg6[%c0_19, %c0_20] : memref<1x1xf32, #tpu.memory_space<vmem>>, vector<1x1xf32>
      %35 = vector.shape_cast %34 : vector<1x1xf32> to vector<1x1x1xf32>
      %c0_21 = arith.constant 0 : index
      %c0_22 = arith.constant 0 : index
      %c0_23 = arith.constant 0 : index
      %36 = vector.load %arg4[%c0_21, %c0_22, %c0_23] : memref<1x1x1xf32, #tpu.memory_space<vmem>>, vector<1x1x1xf32>
      tpu.vector_store %arg4[%c0_21, %c0_22, %c0_23], %35 {strides = array<i32>} : memref<1x1x1xf32, #tpu.memory_space<vmem>>, vector<1x1x1xf32>,
      %c0_24 = arith.constant 0 : index
      %c0_25 = arith.constant 0 : index
      %37 = vector.load %arg7[%c0_24, %c0_25] : memref<8x128xf32, #tpu.memory_space<vmem>>, vector<8x128xf32>
      %38 = vector.shape_cast %37 : vector<8x128xf32> to vector<1x8x128xf32>
      %c0_26 = arith.constant 0 : index
      %c0_27 = arith.constant 0 : index
      %c0_28 = arith.constant 0 : index
      %39 = vector.load %arg5[%c0_26, %c0_27, %c0_28] : memref<1x8x128xf32, #tpu.memory_space<vmem>>, vector<1x8x128xf32>
      tpu.vector_store %arg5[%c0_26, %c0_27, %c0_28], %38 {strides = array<i32>} : memref<1x8x128xf32, #tpu.memory_space<vmem>>, vector<1x8x128xf32>,
    } else {
    }
    return
  }
  func.func @transform_0(%arg0: i32, %arg1: i32) -> (i32, i32) {
    %c1_i32 = arith.constant 1 : i32
    %0 = arith.muli %arg0, %c1_i32 : i32
    %1 = arith.addi %0, %arg1 : i32
    %c0_i32 = arith.constant 0 : i32
    %c0_i32_0 = arith.constant 0 : i32
    return %1, %c0_i32 : i32, i32
  }
  func.func @transform_1(%arg0: i32, %arg1: i32) -> (i32, i32) {
    %c0_i32 = arith.constant 0 : i32
    %c0_i32_0 = arith.constant 0 : i32
    %c0_i32_1 = arith.constant 0 : i32
    return %c0_i32, %c0_i32_0 : i32, i32
  }
  func.func @transform_2(%arg0: i32, %arg1: i32) -> (i32, i32, i32) {
    %c0_i32 = arith.constant 0 : i32
    %c0_i32_0 = arith.constant 0 : i32
    %c0_i32_1 = arith.constant 0 : i32
    return %arg0, %c0_i32, %c0_i32_0 : i32, i32, i32
  }
  func.func @transform_3(%arg0: i32, %arg1: i32) -> (i32, i32, i32) {
    %c0_i32 = arith.constant 0 : i32
    %c0_i32_0 = arith.constant 0 : i32
    %c0_i32_1 = arith.constant 0 : i32
    return %arg0, %c0_i32, %c0_i32_0 : i32, i32, i32
  }
}

</mosaic_0001>

<bundles_post_ra>
// kernel: tpu_custom_call.1
= control target key start
LH: loop header
LB: loop body
LE: loop exit
PB: predicated region body
PF: predicated region fallthrough
CT: control target
= control target key end

     0   :  { %9 = vsyncpa [#allocation5], 0  ;;  %s838_s0 = inlined_call_operand.vmem [shape: f32[64,10], index: 0, kind: input, shape index: {}]   ;;  %s839_s1 = inlined_call_operand.vmem [shape: f32[10,128], index: 1, kind: input, shape index: {}]   ;;  %s840_s2 = inlined_call_operand.vmem [shape: f32[2,1,1], index: 2, kind: output, shape index: {0}]   ;;  %s841_s3 = inlined_call_operand.hbm [shape: f32[2,8,128], index: 3, kind: output, shape index: {1}]  }
   0x1   :  { %11 = vsyncpa [#allocation5 + $0x1], 0  ;;  %s716_s12 = smov 0   ;;  %s718_s13 = smov 0  }
   0x2   :  { %s720_s14 = smov 0   ;;  %s722_s15 = smov 0  }
   0x3   :  { %s724_s16 = smov 0   ;;  %s726_s17 = smov 0  }
   0x4 LB: > { %s506_s18 = sadd.s32 4294967295, %s691_s17   ;;  %s507_s19 = sadd.s32 4294967294, %s691_s17   ;;  %s691_s17 = sphi %s726_s17, %s17_s17   ;;  %s687_s16 = sphi %s724_s16, %s848_s16   ;;  %s683_s15 = sphi %s722_s15, %s847_s15   ;;  %s679_s14 = sphi %s720_s14, %s846_s14   ;;  %s675_s13 = sphi %s718_s13, %s845_s13   ;;  %s671_s12 = sphi %s716_s12, %s844_s12  }
   0x5   : > { %s29_s20 = sadd.s32 1, %s687_s16  ;;  %s111_s21 = sadd.s32 1, %s679_s14 }
   0x6   : > { %p31_p0 = scmp.ge.s32.totalorder %s29_s20, 2  ;;  %p121_p1 = scmp.ne.s32.totalorder %s679_s14, %s675_s13 }
   0x7   : > { %p122_p2 = scmp.eq.s32.totalorder %s506_s18, 1  ;;  %p127_p3 = scmp.ne.s32.totalorder %s675_s13, %s671_s12 }
   0x8   : > { %s850_s20 = smov (%p31_p0, %s29_s20), 0  ;;  %p128_p5 = scmp.eq.s32.totalorder %s507_s19, 1 }
   0x9   : > { %p756_p4 = por %p122_p2, %p121_p1  ;;  %s108_s23 = ssub.s32 %s687_s16, %s850_s20 }
   0xa   : > { %p510_p6 = scmp.ge.s32.totalorder %s691_s17, 1  ;;  %p109_p7 = scmp.eq.s32.totalorder %s108_s23, 0 }
   0xb   : > { %p763_p8 = por %p128_p5, %p127_p3  ;;  %p160_p9 = scmp.lt.s32.totalorder %s691_s17, 3 }
   0xc   : > { %s769_s25 = scalar_select %p109_p7, %s679_s14, %s111_s21  }
   0xd   : > { %p161_p10 = pnand %p510_p6, %p160_p9 }
   0xe   : > { %v210_v0 = vld [vmem:[%s839_s1] sm:$0xff] (!%p161_p10)  ;;  %v211_v1 = vld [vmem:[%s839_s1 + $0x8] sm:$0x3] (!%p161_p10)  ;;  %vm225_vm0 = vcmask (!%p161_p10), 1041408   ;;  %s512_s30 = sshll.u32 (!%p161_p10), %s683_s15, 2  ;;  %vm693_vm1 = vmmov (!%p161_p10), 1  }
   0xf   : > { %164 = sbr.rel (%p161_p10) target bundleno = 434 (0x1b2), region = 28  ;;  %v540_v2 = vpack.c.bf16 (!%p161_p10), %v211_v1, %v210_v0  ;;  %vm541_vm2 = vmpackc.low (!%p161_p10), %vm225_vm0, %vm693_vm1  ;;  %p190_p11 = scmp.lt.s32.totalorder (!%p161_p10), %s512_s30, 7  ;;  %vm212_vm3 = vcmask (!%p161_p10), 80896   ;;  %vm203_vm4 = vcmask (!%p161_p10), 0   ;;  %v694_v15 = vmov (!%p161_p10), 0.0  }
  0x10   : > { %s185_s8 = sand.u32 (!%p161_p10), 1, %s675_s13   ;;  %204 = vst.msk [vmem:[#allocation2] sm:$0x1] (!%p161_p10), %vm203_vm4, %v694_v15  ;;  %s521_s11 = sshll.u32 (!%p161_p10), %s683_s15, 7 }
  0x11   : > { %542 = vmatprep.subr.msk.bf16.mxu0 (!%p161_p10), %vm541_vm2, %v540_v2  ;;  %546 = vmatprep.subr.msk.bf16.mxu1 (!%p161_p10), %vm541_vm2, %v540_v2  ;;  %s511_s9 = sshll.u32 (!%p161_p10), %s185_s8, 3  ;;  %s787_s23 = scalar_lea.hbm (!%p161_p10), %s841_s3, %s521_s11 }
  0x12   : > { %545 = vmatpush3.bf16.msk.msra.mxu0 (!%p161_p10), %vm541_vm2, %v540_v2  ;;  %547 = vmatpush3.bf16.msk.msra.mxu1 (!%p161_p10), %vm541_vm2, %v540_v2  ;;  %s187_s10 = scalar_lea.vmem (!%p161_p10), [#allocation4], %s511_s9  ;;  %s404_s26 = scalar_lea.sflag (!%p161_p10), [#allocation5], %s185_s8 }
  0x13   : > { %s420_s18 = sshll.u32 (!%p161_p10), %s187_s10, 4  ;;  %s695_s28 = smov (!%p161_p10), [#allocation4]   ;;  %s421_s18 = int_to_ptr.vmem [resolvable:$true] %s420_s18 }
  0x14   : > { %s613_s27 = scalar_lea.vmem (!%p161_p10), %s421_s18, 128  ;;  %s617_s29 = sshll.u32 (!%p161_p10), %s695_s28, 4  ;;  %s618_s29 = int_to_ptr.vmem [resolvable:$false] %s617_s29 }
  0x15   : > { %p614_p12 = scmp.ne.s32.totalorder (!%p161_p10), %s421_s18, %s613_s27  ;;  %p620_p1 = scmp.lt.s32.totalorder (!%p161_p10), %s421_s18, %s618_s29 }
  0x16   : > { %s852_s30 = smov (!%p190_p11, %s512_s30), 7 }
  0x17   : > { %s513_s4 = sshll.u32 %s852_s30, 3  ;;  %p615_p13 = pnand %p614_p12, %p756_p4 }
  0x18   : > { %s193_s7 = scalar_lea.vmem %s838_s0, %s513_s4  ;;  %s619_s30 = scalar_lea.vmem %s618_s29, 256 }
  0x19   : > { %v206_v3 = vld [vmem:[%s193_s7] sm:$0xff]  ;;  %v208_v4 = vld [vmem:[%s193_s7 + $0x10] sm:$0xff]  ;;  %v207_v5 = vld [vmem:[%s193_s7 + $0x8] sm:$0xff]  ;;  %p616_p0 = pneg %p615_p13  ;;  %p621_p2 = scmp.lt.s32.totalorder %s619_s30, %s613_s27 }
  0x1a   : > { %534 = vmatprep.mubr.msk.f32.mxu0 %vm212_vm3, %v206_v3  ;;  %537 = vmatprep.mubr.msk.f32.mxu1 %vm212_vm3, %v208_v4  ;;  %v209_v6 = vld [vmem:[%s193_s7 + $0x18] sm:$0xff] }
  0x1b   : > { %535 = vmatmul.mubr.msk.f32.vlgmr.msra.gmra.mrb[0].mxu0 %vm212_vm3, %v207_v5  ;;  %538 = vmatmul.mubr.msk.f32.vlgmr.msra.gmra.mrb[0].mxu1 %vm212_vm3, %v209_v6  ;;  %p622_p3 = por %p621_p2, %p620_p1 }
  0x1d   : > { %p623_p5 = pnand %p622_p3, %p616_p0 }
  0xee   : > { %v536_v7 = vpop.f32.mrb[0].mxu0  ;;  %v539_v8 = vpop.f32.mrb[0].mxu1 }
  0xef   : > { %v295_v9 = vpop.f32.mrb[1].mxu0  ;;  %v305_v10 = vpop.f32.mrb[1].mxu1 }
  0xf0   : > { %v387_v11 = vmin.f32 %v295_v9, %v536_v7  ;;  %v388_v12 = vmin.f32 %v305_v10, %v539_v8  ;;  %318 = vmin.xlane.f32.xlu1 %v305_v10  ;;  %314 = vmin.xlane.f32.xlu0 %v295_v9 }
  0xf2   : > { %v389_v13 = vmin.f32 %v387_v11, %v388_v12 }
  0xf4   : > { %v391_v14 = vmin.f32 %v389_v13, 1e+30  ;;  %320 = vmin.xlane.f32.xlu1 %v539_v8  ;;  %316 = vmin.xlane.f32.xlu0 %v536_v7 }
  0xf6   : > { %399 = vst [vmem:[%s187_s10] sm:$0xff] %v391_v14 }
  0xf7   : > { %626 = shalt.err (!%p623_p5)
}
  0xf8   : > { %s627_s4 = scalar_lea.hbm %s787_s23, 128  ;;  %s631_s7 = scalar_lea.hbm %s841_s3, 256 }
  0xf9   : > { %p628_p6 = scmp.ne.s32.totalorder %s787_s23, %s627_s4  ;;  %p632_p10 = scmp.lt.u32.totalorder %s787_s23, %s841_s3 }
  0xfa   : > { %p633_p11 = scmp.lt.u32.totalorder %s631_s7, %s627_s4  ;;  %p635_p13 = scmp.lt.u32.totalorder %s627_s4, %s787_s23 }
  0xfb   : > { %p629_p7 = pnand %p628_p6, %p756_p4 }
  0xfc   : > { %p634_p12 = por %p633_p11, %p632_p10 }
  0xfd   : > { %p630_p9 = pneg %p629_p7 }
  0xfe   : > { %p636_p0 = por %p635_p13, %p634_p12 }
 0x100   : > { %p637_p1 = pnand %p636_p0, %p630_p9 }
 0x102   : > { %640 = shalt.err (!%p637_p1)
}
 0x103   : > { %548 = dma.vmem_to_hbm [thread:$0]  (%p756_p4), %s421_s18, 128, %s787_s23, %s404_s26   ;;  %v356_v20 = vlaneseq  ;;  %v374_v2 = vld [vmem:[#allocation2] sm:$0x1] }
 0x104   : > { %s519_s10 = sshll.u32 %s683_s15, 5  ;;  %p196_p4 = scmp.lt.s32.totalorder %s683_s15, 1 }
 0x105   : > { %v357_v25 = vshrl.u32 %v356_v20, 7  ;;  %v361_v26 = vstv %s519_s10 }
 0x106   : > { %s854_s15 = smov (!%p196_p4, %s683_s15), 1 }
 0x107   : > { %v358_v27 = vadd.s32 8, %v357_v25  ;;  %v359_v29 = vadd.s32 16, %v357_v25  ;;  %v362_v30 = vadd.s32 %v361_v26, %v357_v25  ;;  %v360_v31 = vadd.s32 24, %v357_v25  ;;  %s198_s18 = scalar_lea.vmem %s840_s2, %s854_s15 }
 0x109   : > { %v363_v33 = vadd.s32 %v361_v26, %v358_v27  ;;  %v364_v37 = vadd.s32 %v361_v26, %v359_v29  ;;  %vm366_vm6 = vcmp.lt.s32.totalorder %v362_v30, 64  ;;  %v365_v39 = vadd.s32 %v361_v26, %v360_v31 }
 0x10b   : > { %vm367_vm8 = vcmp.lt.s32.totalorder %v363_v33, 64  ;;  %vm368_vm14 = vcmp.lt.s32.totalorder %v364_v37, 64  ;;  %vm369_vm0 = vcmp.lt.s32.totalorder %v365_v39, 64 }
 0x17d   : > { %v319_v16 = vpop.xlane.xlu1 %318  ;;  %v315_v17 = vpop.xlane.xlu0 %314 }
 0x17e   : > { %v324_v18 = vmax.f32 %v319_v16, 0.0  ;;  %v322_v19 = vmax.f32 %v315_v17, 0.0 }
 0x180   : > { %605 = vrsqrt.f32 %v324_v18  ;;  %vm328_vm5 = vcmp.eq.f32.partialorder %v322_v19, inf  ;;  %vm342_vm7 = vcmp.eq.f32.partialorder %v324_v18, inf  ;;  %v331_v41 = vand.u32 2147483648, %v322_v19 }
 0x181   : > { %607 = vrsqrt.f32 %v322_v19  ;;  %v321_v21 = vpop.xlane.xlu1 %320  ;;  %v317_v22 = vpop.xlane.xlu0 %316  ;;  %v345_v44 = vand.u32 2147483648, %v324_v18  ;;  %vm330_vm9 = vcmp.eq.f32.partialorder %v322_v19, 0.0  ;;  %vm344_vm12 = vcmp.eq.f32.partialorder %v324_v18, 0.0 }
 0x182   : > { %v325_v23 = vmax.f32 %v321_v21, 0.0  ;;  %v323_v24 = vmax.f32 %v317_v22, 0.0 }
 0x184   : > { %609 = vrsqrt.f32 %v325_v23  ;;  %vm349_vm10 = vcmp.eq.f32.partialorder %v325_v23, inf  ;;  %vm335_vm11 = vcmp.eq.f32.partialorder %v323_v24, inf  ;;  %v338_v47 = vand.u32 2147483648, %v323_v24 }
 0x185   : > { %611 = vrsqrt.f32 %v323_v24  ;;  %vm337_vm13 = vcmp.eq.f32.partialorder %v323_v24, 0.0  ;;  %v352_v51 = vand.u32 2147483648, %v325_v23  ;;  %vm351_vm15 = vcmp.eq.f32.partialorder %v325_v23, 0.0 }
 0x18a   : > { %v606_v28 = vpop.eup %605 }
 0x18b   : > { %v608_v32 = vpop.eup %607  ;;  %v341_v34 = vmul.f32 %v606_v28, %v324_v18 }
 0x18c   : > { %v327_v35 = vmul.f32 %v608_v32, %v322_v19 }
 0x18d   : > { %v343_v43 = vsel %vm342_vm7, %v324_v18, %v341_v34 }
 0x18e   : > { %v610_v36 = vpop.eup %609  ;;  %v329_v38 = vsel %vm328_vm5, %v322_v19, %v327_v35  ;;  %v346_v50 = vsel %vm344_vm12, %v345_v44, %v343_v43 }
 0x18f   : > { %v612_v40 = vpop.eup %611  ;;  %v348_v42 = vmul.f32 %v610_v36, %v325_v23  ;;  %v332_v46 = vsel %vm330_vm9, %v331_v41, %v329_v38  ;;  %v372_v57 = vsel %vm368_vm14, %v346_v50, 0.0 }
 0x190   : > { %v334_v45 = vmul.f32 %v612_v40, %v323_v24  ;;  %v370_v53 = vsel %vm366_vm6, %v332_v46, 0.0 }
 0x191   : > { %v350_v48 = vsel %vm349_vm10, %v325_v23, %v348_v42 }
 0x192   : > { %v336_v49 = vsel %vm335_vm11, %v323_v24, %v334_v45  ;;  %v353_v55 = vsel %vm351_vm15, %v352_v51, %v350_v48 }
 0x193   : > { %v339_v52 = vsel %vm337_vm13, %v338_v47, %v336_v49  ;;  %v373_v59 = vsel %vm369_vm0, %v353_v55, 0.0 }
 0x194   : > { %v371_v54 = vsel %vm367_vm8, %v339_v52, 0.0 }
 0x195   : > { %v375_v56 = vadd.f32 %v371_v54, %v370_v53 }
 0x197   : > { %v376_v58 = vadd.f32 %v375_v56, %v372_v57 }
 0x199   : > { %v377_v60 = vadd.f32 %v376_v58, %v373_v59 }
 0x19b   : > { %v378_v61 = vrot.slane %v377_v60, 4 }
 0x19d   : > { %v379_v62 = vadd.f32 %v378_v61, %v377_v60 }
 0x19f   : > { %v380_v63 = vrot.slane %v379_v62, 2 }
 0x1a1   : > { %v381_v0 = vadd.f32 %v380_v63, %v379_v62 }
 0x1a3   : > { %v382_v1 = vrot.slane %v381_v0, 1 }
 0x1a5   : > { %v383_v3 = vadd.f32 %v382_v1, %v381_v0 }
 0x1a7   : > { %v384_v4 = vadd.f32 %v383_v3, %v374_v2 }
 0x1a9   : > { %386 = vst.msk [vmem:[#allocation2] sm:$0x1] %vm203_vm4, %v384_v4 }
 0x1b0   : > { %v396_v5 = vld [vmem:[#allocation2] sm:$0x1] }
 0x1b1   : > { %397 = vst.msk [vmem:[%s198_s18] sm:$0x1] %vm203_vm4, %v396_v5 }
 0x1b2 PF: > { %p554_p2 = scmp.ge.s32.totalorder %s691_s17, 2  ;;  %s438_s19 = sand.u32 1, %s671_s12  }
 0x1b3   : > { %s439_s21 = scalar_lea.sflag [#allocation5], %s438_s19 }
 0x1b4   : > { %p551_p3 = pnand %p554_p2, %p763_p8 }
 0x1b6   : > { %666 = dma.done.wait (!%p551_p3), %s439_s21, 128  }
 0x1b7   : > { %668 = vsyncadd (!%p551_p3), %s439_s21, 4294967168  ;;  %s17_s17 = sadd.s32 1, %s691_s17   ;;  %s844_s12 = smov %s675_s13 }
 0x1b8   : > { %p14_p5 = scmp.ge.s32.totalorder %s17_s17, 4   ;;  %s845_s13 = smov %s679_s14 }
 0x1b9   : > { %s846_s14 = smov %s769_s25  ;;  %s847_s15 = smov %s687_s16 }
 0x1ba   : > { %s848_s16 = smov %s850_s20  ;;  %16 = sbr.rel (!%p14_p5) target bundleno = 4 (0x4), region = 83 }
 0x1c1   :  { %444 = vsyncpa [#allocation5], 1 }
 0x1c2   :  { %446 = vsyncpa [#allocation5 + $0x1], 1 }

</bundles_post_ra>
